<compile_context>
chip_gen: v5e
topology: v5e:2x2
jax: 0.10.0
libtpu: 0.0.40
codegen_flags: <defaults>
</compile_context>

<pallas_src>
import jax
import jax.numpy as jnp
from jax.experimental import pallas as pl
from jax.experimental.pallas import tpu as pltpu


_ROW_GRANULE = 16                   # covers f32 (8-row) and bf16 (16-row) sublane packing
_LANE = 128
_NEG_PAD = -1e9                     # finite "-inf": exp -> 0 and softplus -> 0, no 0*inf NaN
_POS_PAD = 1e9                      # softplus(-1e9) == 0 exactly
_TARGET_TILE_BYTES = 8 * 1024 * 1024  # ~8 MiB neg tile (review: 4-8 MiB sweet spot)


def _round_up(x: int, m: int) -> int:
    return ((x + m - 1) // m) * m


def _softplus(x):
    # Numerically stable softplus: max(x, 0) + log(1 + exp(-|x|)).
    return jnp.maximum(x, 0.0) + jnp.log(1.0 + jnp.exp(-jnp.abs(x)))


def _make_adv_loss_kernel(temperature: float, softmax_exp_dtype):
    inv_temp = 1.0 / float(temperature)

    def kernel(pos_ref, neg_ref, out_ref):
        pos = pos_ref[...].astype(jnp.float32)      # (1, TB)   lane-dense
        neg = neg_ref[...].astype(jnp.float32)      # (TB, Kp)  (bf16 transport upcast here)

        # Positive term: -log(sigmoid(x)) == softplus(-x).
        pos_sum = jnp.sum(_softplus(-pos))

        # Softmax over negatives without materializing the weights.
        logits = neg if inv_temp == 1.0 else neg * inv_temp
        m = jnp.max(logits, axis=1, keepdims=True)                      # (TB, 1)
        z = logits - m
        if softmax_exp_dtype != jnp.float32:
            # v6e/v7x: bf16 exp halves EUP work; weights only need ~1e-3 accuracy.
            e = jnp.exp(z.astype(softmax_exp_dtype)).astype(jnp.float32)
        else:
            e = jnp.exp(z)                                              # (TB, Kp)
        denom = jnp.sum(e, axis=1, keepdims=True)                       # (TB, 1)

        # Negative term: -log(1 - sigmoid(x)) == softplus(x).
        row_num = jnp.sum(e * _softplus(neg), axis=1, keepdims=True)    # (TB, 1)
        neg_sum = jnp.sum(row_num * pl.reciprocal(denom, approx=True))

        partial = pos_sum + neg_sum
        out_ref[...] = jnp.broadcast_to(partial, (1, 1, _LANE))

    return kernel


def adversarial_loss(pos_scores, neg_scores, temperature: float = 1.0, *,
                     block_rows=None, softmax_exp_dtype=jnp.float32):
    """Pallas TPU implementation of AdversarialLoss.forward.

    pos_scores: (B,) or (B, 1) float
    neg_scores: (B, K) float32 (or bfloat16 to halve HBM->VMEM DMA; math stays f32)
    returns: scalar float32 loss
    """
    pos = jnp.asarray(pos_scores, jnp.float32).reshape(1, -1)      # lane-dense (1, B)
    neg = jnp.asarray(neg_scores)
    if neg.dtype != jnp.bfloat16:
        neg = neg.astype(jnp.float32)
    B, K = int(neg.shape[0]), int(neg.shape[1])
    assert pos.shape[1] == B

    k_pad = _round_up(K, _LANE)
    elt = jnp.dtype(neg.dtype).itemsize

    # --- pick the row tile: biggest tile that keeps neg within ~8 MiB ----------------
    if block_rows is not None:
        tb = _round_up(int(block_rows), _ROW_GRANULE)
    else:
        rows_budget = max(_ROW_GRANULE, _TARGET_TILE_BYTES // (elt * k_pad))
        if _round_up(B, _ROW_GRANULE) <= rows_budget:
            tb = _round_up(B, _ROW_GRANULE)                         # single tile
        else:
            tb = max(_LANE, (rows_budget // _LANE) * _LANE)
    num_tiles = -(-B // tb)
    if num_tiles > 1 and tb % _LANE != 0:
        # lane-dense pos block (1, tb) needs tb % 128 == 0 unless it spans the batch
        tb = _round_up(tb, _LANE)
        num_tiles = -(-B // tb)
    b_pad = num_tiles * tb

    # --- pad with sentinels so padded rows/columns contribute exactly 0 --------------
    if b_pad != B:
        pos = jnp.pad(pos, ((0, 0), (0, b_pad - B)), constant_values=_POS_PAD)
    if b_pad != B or k_pad != K:
        neg = jnp.pad(neg, ((0, b_pad - B), (0, k_pad - K)), constant_values=_NEG_PAD)

    neg_tile_bytes = tb * k_pad * elt
    pos_tile_bytes = tb * 4
    vmem_limit = max(32 << 20,
                     2 * (neg_tile_bytes + pos_tile_bytes + _LANE * 4) + (4 << 20))

    kernel = _make_adv_loss_kernel(temperature, softmax_exp_dtype)

    partials = pl.pallas_call(
        kernel,
        out_shape=jax.ShapeDtypeStruct((num_tiles, 1, _LANE), jnp.float32),
        grid=(num_tiles,),
        in_specs=[
            pl.BlockSpec((1, tb), lambda i: (0, i)),          # pos: lane-dense row tile
            pl.BlockSpec((tb, k_pad), lambda i: (i, 0)),      # neg: (TB, Kp) tile
        ],
        out_specs=pl.BlockSpec((1, 1, _LANE), lambda i: (i, 0, 0)),
        compiler_params=pltpu.CompilerParams(
            dimension_semantics=("parallel",),   # no carried state -> megacore-shardable
            vmem_limit_bytes=int(vmem_limit),
        ),
    )(pos, neg)

    # Tiny final reduction + 1/B normalization in the wrapper (uses true B, not B_pad).
    return jnp.sum(partials[:, 0, 0]) * (1.0 / B)


def _reference(pos_scores, neg_scores, temperature=1.0):
    pos = jnp.asarray(pos_scores, jnp.float32).reshape(-1)
    neg = jnp.asarray(neg_scores, jnp.float32)
    pos_loss = -jnp.mean(jnp.log(jax.nn.sigmoid(pos)))
    w = jax.nn.softmax(neg / temperature, axis=1)
    neg_loss = -jnp.mean(jnp.sum(w * jnp.log(1.0 - jax.nn.sigmoid(neg)), axis=1))
    return pos_loss + neg_loss


if __name__ == "__main__":
    key = jax.random.PRNGKey(0)
    k1, k2, k3, k4 = jax.random.split(key, 4)

    # Case 1: ragged B and ragged K -> row + column sentinel padding, single tile.
    B1, K1 = 20, 200
    pos1 = jax.random.normal(k1, (B1,), dtype=jnp.float32)
    neg1 = jax.random.normal(k2, (B1, K1), dtype=jnp.float32)
    loss1 = jax.block_until_ready(adversarial_loss(pos1, neg1, temperature=1.0))
    ref1 = _reference(pos1, neg1, 1.0)
    assert jnp.allclose(loss1, ref1, rtol=2e-4, atol=2e-4), (loss1, ref1)

    # Case 2: multi-tile grid (exercises the "parallel" row axis) + non-default T.
    B2, K2 = 300, 128
    pos2 = jax.random.normal(k3, (B2,), dtype=jnp.float32)
    neg2 = jax.random.normal(k4, (B2, K2), dtype=jnp.float32)
    loss2 = jax.block_until_ready(adversarial_loss(pos2, neg2, temperature=0.5,
                                                   block_rows=128))
    ref2 = _reference(pos2, neg2, 0.5)
    assert jnp.allclose(loss2, ref2, rtol=2e-4, atol=2e-4), (loss2, ref2)

    # Case 3: bf16 neg transport (halves DMA bytes; all math stays f32 in-kernel).
    neg3 = neg2.astype(jnp.bfloat16)
    loss3 = jax.block_until_ready(adversarial_loss(pos2, neg3, temperature=0.5,
                                                   block_rows=128))
    ref3 = _reference(pos2, neg3.astype(jnp.float32), 0.5)
    assert jnp.allclose(loss3, ref3, rtol=2e-4, atol=2e-4), (loss3, ref3)

    print("KERNEL_OK")
</pallas_src>

<mosaic_0001>
module attributes {stable_mosaic.version = 11 : i64} {
  func.func @kernel(%arg0: i32, %arg1: memref<1x32xf32, #tpu.memory_space<vmem>>, %arg2: memref<32x256xf32, #tpu.memory_space<vmem>>, %arg3: memref<1x1x128xf32, #tpu.memory_space<vmem>>) attributes {dimension_semantics = [#tpu.dimension_semantics<parallel>], iteration_bounds = array<i64: 1>, scalar_prefetch = 0 : i64, scratch_operands = 0 : i64, tpu.core_type = #tpu.core_type<tc>, window_params = [{transform_indices = @transform_0, window_bounds = array<i64: 1, 32>}, {transform_indices = @transform_1, window_bounds = array<i64: 32, 256>}, {transform_indices = @transform_2, window_bounds = array<i64: 1, 1, 128>}]} {
    %c0 = arith.constant 0 : index
    %c0_0 = arith.constant 0 : index
    %0 = vector.load %arg1[%c0, %c0_0] : memref<1x32xf32, #tpu.memory_space<vmem>>, vector<1x32xf32>
    %c0_1 = arith.constant 0 : index
    %c0_2 = arith.constant 0 : index
    %1 = vector.load %arg2[%c0_1, %c0_2] : memref<32x256xf32, #tpu.memory_space<vmem>>, vector<32x256xf32>
    %cst = arith.constant 0.000000e+00 : f32
    %2 = vector.broadcast %cst : f32 to vector<1x32xf32>
    %3 = arith.subf %2, %0 : vector<1x32xf32>
    %cst_3 = arith.constant 0.000000e+00 : f32
    %4 = vector.broadcast %cst_3 : f32 to vector<1x32xf32>
    %5 = arith.maximumf %3, %4 : vector<1x32xf32>
    %6 = math.absf %3 : vector<1x32xf32>
    %cst_4 = arith.constant 0.000000e+00 : f32
    %7 = vector.broadcast %cst_4 : f32 to vector<1x32xf32>
    %8 = arith.subf %7, %6 : vector<1x32xf32>
    %9 = math.exp %8 : vector<1x32xf32>
    %cst_5 = arith.constant 1.000000e+00 : f32
    %10 = vector.broadcast %cst_5 : f32 to vector<1x32xf32>
    %11 = arith.addf %10, %9 : vector<1x32xf32>
    %12 = math.log %11 : vector<1x32xf32>
    %13 = arith.addf %5, %12 : vector<1x32xf32>
    %14 = vector.shape_cast %13 : vector<1x32xf32> to vector<1x1x32xf32>
    %cst_6 = arith.constant dense<0.000000e+00> : vector<1xf32>
    %15 = vector.multi_reduction <add>, %14, %cst_6 [1, 2] : vector<1x1x32xf32> to vector<1xf32>
    %16 = vector.shape_cast %15 : vector<1xf32> to vector<1x1x1xf32>
    %17 = vector.extract %16[0, 0, 0] : f32 from vector<1x1x1xf32>
    %cst_7 = arith.constant dense<0xFF800000> : vector<32xf32>
    %18 = vector.multi_reduction <maximumf>, %1, %cst_7 [1] : vector<32x256xf32> to vector<32xf32>
    %19 = vector.shape_cast %18 : vector<32xf32> to vector<32x1xf32>
    %20 = vector.broadcast %19 : vector<32x1xf32> to vector<32x256xf32>
    %21 = arith.subf %1, %20 : vector<32x256xf32>
    %22 = math.exp %21 : vector<32x256xf32>
    %cst_8 = arith.constant dense<0.000000e+00> : vector<32xf32>
    %23 = vector.multi_reduction <add>, %22, %cst_8 [1] : vector<32x256xf32> to vector<32xf32>
    %24 = vector.shape_cast %23 : vector<32xf32> to vector<32x1xf32>
    %cst_9 = arith.constant 0.000000e+00 : f32
    %25 = vector.broadcast %cst_9 : f32 to vector<32x256xf32>
    %26 = arith.maximumf %1, %25 : vector<32x256xf32>
    %27 = math.absf %1 : vector<32x256xf32>
    %cst_10 = arith.constant 0.000000e+00 : f32
    %28 = vector.broadcast %cst_10 : f32 to vector<32x256xf32>
    %29 = arith.subf %28, %27 : vector<32x256xf32>
    %30 = math.exp %29 : vector<32x256xf32>
    %cst_11 = arith.constant 1.000000e+00 : f32
    %31 = vector.broadcast %cst_11 : f32 to vector<32x256xf32>
    %32 = arith.addf %31, %30 : vector<32x256xf32>
    %33 = math.log %32 : vector<32x256xf32>
    %34 = arith.addf %26, %33 : vector<32x256xf32>
    %35 = arith.mulf %22, %34 : vector<32x256xf32>
    %cst_12 = arith.constant dense<0.000000e+00> : vector<32xf32>
    %36 = vector.multi_reduction <add>, %35, %cst_12 [1] : vector<32x256xf32> to vector<32xf32>
    %37 = vector.shape_cast %36 : vector<32xf32> to vector<32x1xf32>
    %38 = tpu.reciprocal %24 {approx = true} : vector<32x1xf32> -> vector<32x1xf32>
    %39 = arith.mulf %37, %38 : vector<32x1xf32>
    %40 = vector.shape_cast %39 : vector<32x1xf32> to vector<1x32x1xf32>
    %cst_13 = arith.constant dense<0.000000e+00> : vector<1xf32>
    %41 = vector.multi_reduction <add>, %40, %cst_13 [1, 2] : vector<1x32x1xf32> to vector<1xf32>
    %42 = vector.shape_cast %41 : vector<1xf32> to vector<1x1x1xf32>
    %43 = vector.extract %42[0, 0, 0] : f32 from vector<1x1x1xf32>
    %44 = arith.addf %17, %43 : f32
    %45 = vector.broadcast %44 : f32 to vector<1x1x128xf32>
    %c0_14 = arith.constant 0 : index
    %c0_15 = arith.constant 0 : index
    %c0_16 = arith.constant 0 : index
    %46 = vector.load %arg3[%c0_14, %c0_15, %c0_16] : memref<1x1x128xf32, #tpu.memory_space<vmem>>, vector<1x1x128xf32>
    tpu.vector_store %arg3[%c0_14, %c0_15, %c0_16], %45 {strides = array<i32>} : memref<1x1x128xf32, #tpu.memory_space<vmem>>, vector<1x1x128xf32>,
    return
  }
  func.func @transform_0(%arg0: i32) -> (i32, i32) {
    %c0_i32 = arith.constant 0 : i32
    %c0_i32_0 = arith.constant 0 : i32
    return %c0_i32, %arg0 : i32, i32
  }
  func.func @transform_1(%arg0: i32) -> (i32, i32) {
    %c0_i32 = arith.constant 0 : i32
    %c0_i32_0 = arith.constant 0 : i32
    return %arg0, %c0_i32 : i32, i32
  }
  func.func @transform_2(%arg0: i32) -> (i32, i32, i32) {
    %c0_i32 = arith.constant 0 : i32
    %c0_i32_0 = arith.constant 0 : i32
    %c0_i32_1 = arith.constant 0 : i32
    return %arg0, %c0_i32, %c0_i32_0 : i32, i32, i32
  }
}

</mosaic_0001>

<bundles_post_ra>
// kernel: tpu_custom_call.1
= control target key start
LH: loop header
LB: loop body
LE: loop exit
PB: predicated region body
PF: predicated region fallthrough
CT: control target
= control target key end

     0   :  { %7 = vsyncpa [#allocation3], 0  ;;  %s486_s0 = inlined_call_operand.hbm [shape: f32[1,32], index: 0, kind: input, shape index: {}]   ;;  %s487_s1 = inlined_call_operand.hbm [shape: f32[32,256], index: 1, kind: input, shape index: {}]   ;;  %s488_s2 = inlined_call_operand.hbm [shape: f32[1,1,128], index: 2, kind: output, shape index: {}]  }
   0x1   :  { %8 = vsyncpa [#allocation6], 0 }
   0x2   :  { %9 = vsyncpa [#allocation4], 0  ;;  %s15_s11 = sshll.u32 %s486_s0, 4  ;;  %s405_s12 = smov [#allocation2]   ;;  %s16_s11 = int_to_ptr.hbm [resolvable:$true] %s15_s11 }
   0x3   :  { %s17_s13 = sshll.u32 %s405_s12, 4  ;;  %s25_s16 = sshll.u32 %s487_s1, 4  ;;  %s18_s13 = int_to_ptr.vmem [resolvable:$true] %s17_s13  ;;  %s26_s16 = int_to_ptr.hbm [resolvable:$true] %s25_s16 }
   0x4   :  { %20 = dma.hbm_to_vmem [thread:$0]  %s16_s11, 16, %s18_s13, [#allocation3]  }
   0x5   :  { %s406_s17 = smov [#allocation5]   ;;  %s407_s19 = smov 256  }
   0x6   :  { %s27_s18 = sshll.u32 %s406_s17, 4  ;;  %s408_s20 = smov 16   ;;  %s28_s18 = int_to_ptr.vmem [resolvable:$true] %s27_s18 }
   0x7   :  { %33 = dma.hbm_to_vmem [thread:$0]  %s26_s16, 1024, %s28_s18, [#allocation6], %s407_s19, %s407_s19, %s408_s20  }
   0x8   :  { %399 = dma.done.wait [#allocation3], 16  }
   0x9   :  { %400 = vsyncadd [#allocation3], 4294967280 }
   0xa   :  { %401 = dma.done.wait [#allocation6], 1024  }
   0xb   :  { %402 = vsyncadd [#allocation6], 4294966272  ;;  %v431_v0 = vld [vmem:[#allocation5 + $0x20] sm:$0xff]  ;;  %v433_v1 = vld [vmem:[#allocation5 + $0x28] sm:$0xff]  ;;  %vm61_vm0 = vcmask 253952   ;;  %vm220_vm1 = vcmask 7168  }
   0xc   :  { %v435_v2 = vld [vmem:[#allocation5] sm:$0xff]  ;;  %v78_v3 = vmax.f32 %v431_v0, %v433_v1  ;;  %v439_v4 = vld [vmem:[#allocation5 + $0x8] sm:$0xff]  ;;  %v443_v6 = vld [vmem:[#allocation5 + $0x30] sm:$0xff]  ;;  %v132_v12 = vand.u32 2147483647, %v431_v0  ;;  %s409_s0 = smov [#allocation7]  }
   0xd   :  { %v72_v5 = vmax.f32 %v435_v2, %v439_v4  ;;  %v445_v7 = vld [vmem:[#allocation5 + $0x38] sm:$0xff]  ;;  %v447_v8 = vld [vmem:[#allocation5 + $0x10] sm:$0xff]  ;;  %v133_v13 = vand.u32 2147483647, %v433_v1  ;;  %v128_v21 = vand.u32 2147483647, %v435_v2 }
   0xe   :  { %79 = vmax.xlane.f32.xlu1 %v78_v3  ;;  %v449_v9 = vld [vmem:[#allocation5 + $0x18] sm:$0xff]  ;;  %v81_v10 = vmax.f32 %v443_v6, %v445_v7  ;;  %v130_v14 = vand.u32 2147483647, %v447_v8  ;;  %v140_v16 = vsub.f32 0.0, %v132_v12  ;;  %v129_v23 = vand.u32 2147483647, %v439_v4 }
   0xf   :  { %73 = vmax.xlane.f32.xlu0 %v72_v5  ;;  %v75_v11 = vmax.f32 %v447_v8, %v449_v9  ;;  %v131_v15 = vand.u32 2147483647, %v449_v9  ;;  %v141_v17 = vsub.f32 0.0, %v133_v13  ;;  %v134_v25 = vand.u32 2147483647, %v443_v6  ;;  %s245_s1 = sshll.u32 %s409_s0, 4  ;;  %s246_s1 = int_to_ptr.vmem [resolvable:$true] %s245_s1 }
  0x10   :  { %v138_v18 = vsub.f32 0.0, %v130_v14  ;;  %v152_v20 = vmul.f32 1.442695, %v140_v16  ;;  %v136_v27 = vsub.f32 0.0, %v128_v21  ;;  %v135_v28 = vand.u32 2147483647, %v445_v7 }
  0x11   :  { %v139_v19 = vsub.f32 0.0, %v131_v15  ;;  %v154_v22 = vmul.f32 1.442695, %v141_v17  ;;  %v137_v29 = vsub.f32 0.0, %v129_v23  ;;  %v142_v30 = vsub.f32 0.0, %v134_v25  ;;  %s247_s24 = sshll.u32 %s488_s2, 4  ;;  %s248_s24 = int_to_ptr.hbm [resolvable:$true] %s247_s24 }
  0x12   :  { %v148_v24 = vmul.f32 1.442695, %v138_v18  ;;  %267 = vpow2.f32 %v152_v20  ;;  %v144_v31 = vmul.f32 1.442695, %v136_v27  ;;  %v143_v32 = vsub.f32 0.0, %v135_v28 }
  0x13   :  { %v150_v26 = vmul.f32 1.442695, %v139_v19  ;;  %269 = vpow2.f32 %v154_v22  ;;  %v146_v33 = vmul.f32 1.442695, %v137_v29  ;;  %v156_v36 = vmul.f32 1.442695, %v142_v30 }
  0x14   :  { %271 = vpow2.f32 %v148_v24  ;;  %v158_v38 = vmul.f32 1.442695, %v143_v32  ;;  %v122_v24 = vmax.f32 %v447_v8, 0.0  ;;  %v123_v29 = vmax.f32 %v449_v9, 0.0 }
  0x15   :  { %273 = vpow2.f32 %v150_v26  ;;  %v124_v32 = vmax.f32 %v431_v0, 0.0 }
  0x16   :  { %82 = vmax.xlane.f32.xlu1 %v81_v10  ;;  %275 = vpow2.f32 %v144_v31 }
  0x17   :  { %76 = vmax.xlane.f32.xlu0 %v75_v11  ;;  %277 = vpow2.f32 %v146_v33  ;;  %v125_v33 = vmax.f32 %v433_v1, 0.0 }
  0x18   :  { %v268_v34 = vpop.eup %267  ;;  %279 = vpow2.f32 %v156_v36  ;;  %v120_v36 = vmax.f32 %v435_v2, 0.0 }
  0x19   :  { %v270_v35 = vpop.eup %269  ;;  %v164_v40 = vadd.f32 1.0, %v268_v34  ;;  %281 = vpow2.f32 %v158_v38 }
  0x1a   :  { %v272_v37 = vpop.eup %271  ;;  %v165_v41 = vadd.f32 1.0, %v270_v35 }
  0x1b   :  { %v274_v39 = vpop.eup %273  ;;  %v162_v42 = vadd.f32 1.0, %v272_v37  ;;  %283 = vlog2.f32 %v164_v40 }
  0x1c   :  { %v163_v44 = vadd.f32 1.0, %v274_v39  ;;  %v276_v48 = vpop.eup %275  ;;  %285 = vlog2.f32 %v165_v41  ;;  %v121_v39 = vmax.f32 %v439_v4, 0.0 }
  0x1d   :  { %v278_v51 = vpop.eup %277  ;;  %287 = vlog2.f32 %v162_v42  ;;  %v160_v57 = vadd.f32 1.0, %v276_v48 }
  0x1e   :  { %289 = vlog2.f32 %v163_v44  ;;  %v280_v56 = vpop.eup %279  ;;  %v161_v59 = vadd.f32 1.0, %v278_v51 }
  0x1f   :  { %v282_v58 = vpop.eup %281  ;;  %v166_v22 = vadd.f32 1.0, %v280_v56 }
  0x20   :  { %v167_v26 = vadd.f32 1.0, %v282_v58 }
  0x21   :  { %v284_v60 = vpop.eup %283 }
  0x22   :  { %v286_v61 = vpop.eup %285  ;;  %v177_v34 = vmul.f32 0.6931472, %v284_v60 }
  0x23   :  { %v288_v63 = vpop.eup %287  ;;  %v179_v35 = vmul.f32 0.6931472, %v286_v61 }
  0x24   :  { %v290_v11 = vpop.eup %289  ;;  %v173_v25 = vmul.f32 0.6931472, %v288_v63 }
  0x25   :  { %v175_v30 = vmul.f32 0.6931472, %v290_v11  ;;  %v189_v44 = vadd.f32 %v179_v35, %v125_v33 }
  0x27   :  { %v187_v38 = vadd.f32 %v175_v30, %v123_v29 }
  0x81   :  { %v80_v43 = vpop.xlane.xlu1 %79 }
  0x82   :  { %v88_v45 = vsub.f32 %v431_v0, %v80_v43  ;;  %v89_v46 = vsub.f32 %v433_v1, %v80_v43  ;;  %v74_v47 = vpop.xlane.xlu0 %73  ;;  %v188_v0 = vadd.f32 %v177_v34, %v124_v32 }
  0x83   :  { %v84_v49 = vsub.f32 %v435_v2, %v74_v47  ;;  %v85_v50 = vsub.f32 %v439_v4, %v74_v47 }
  0x84   :  { %v100_v52 = vmul.f32 1.442695, %v88_v45  ;;  %v102_v53 = vmul.f32 1.442695, %v89_v46 }
  0x85   :  { %v92_v54 = vmul.f32 1.442695, %v84_v49  ;;  %v94_v55 = vmul.f32 1.442695, %v85_v50 }
  0x86   :  { %291 = vpow2.f32 %v100_v52 }
  0x87   :  { %293 = vpow2.f32 %v102_v53  ;;  %v126_v53 = vmax.f32 %v443_v6, 0.0 }
  0x88   :  { %295 = vpow2.f32 %v92_v54  ;;  %v127_v54 = vmax.f32 %v445_v7, 0.0 }
  0x89   :  { %297 = vpow2.f32 %v94_v55  ;;  %v83_v62 = vpop.xlane.xlu1 %82 }
  0x8a   :  { %v90_v3 = vsub.f32 %v443_v6, %v83_v62  ;;  %v91_v5 = vsub.f32 %v445_v7, %v83_v62  ;;  %v77_v10 = vpop.xlane.xlu0 %76  ;;  %299 = vlog2.f32 %v160_v57 }
  0x8b   :  { %v86_v12 = vsub.f32 %v447_v8, %v77_v10  ;;  %v87_v13 = vsub.f32 %v449_v9, %v77_v10  ;;  %301 = vlog2.f32 %v161_v59  ;;  %v186_v8 = vadd.f32 %v173_v25, %v122_v24  ;;  %v42_v10 = vld [vmem:[#allocation2] sm:$0x1] }
  0x8c   :  { %v292_v14 = vpop.eup %291  ;;  %v104_v15 = vmul.f32 1.442695, %v90_v3  ;;  %v106_v16 = vmul.f32 1.442695, %v91_v5  ;;  %v51_v11 = vsub.f32 0.0, %v42_v10 }
  0x8d   :  { %v294_v17 = vpop.eup %293  ;;  %v96_v18 = vmul.f32 1.442695, %v86_v12  ;;  %v98_v19 = vmul.f32 1.442695, %v87_v13  ;;  %v196_v52 = vmul.f32 %v292_v14, %v188_v0 }
  0x8e   :  { %v296_v20 = vpop.eup %295  ;;  %303 = vpow2.f32 %v104_v15  ;;  %v114_v21 = vadd.f32 %v294_v17, %v292_v14  ;;  %v197_v4 = vmul.f32 %v294_v17, %v189_v44  ;;  %v53_v6 = vand.u32 2147483647, %v51_v11 }
  0x8f   :  { %v298_v23 = vpop.eup %297  ;;  %305 = vpow2.f32 %v106_v16  ;;  %v52_v16 = vmax.f32 %v51_v11, 0.0 }
  0x90   :  { %v300_v27 = vpop.eup %299  ;;  %307 = vpow2.f32 %v96_v18  ;;  %v108_v28 = vadd.f32 %v298_v23, %v296_v20  ;;  %115 = vadd.xlane.f32.xlu0 %v114_v21  ;;  %v206_v59 = vadd.f32 %v197_v4, %v196_v52  ;;  %v54_v12 = vsub.f32 0.0, %v53_v6 }
  0x91   :  { %v302_v31 = vpop.eup %301  ;;  %309 = vpow2.f32 %v98_v19  ;;  %v169_v9 = vmul.f32 0.6931472, %v300_v27 }
  0x92   :  { %109 = vadd.xlane.f32.xlu2 %v108_v28  ;;  %311 = vlog2.f32 %v166_v22  ;;  %v171_v40 = vmul.f32 0.6931472, %v302_v31  ;;  %v55_v7 = vmul.f32 1.442695, %v54_v12 }
  0x93   :  { %313 = vlog2.f32 %v167_v26  ;;  %v184_v49 = vadd.f32 %v169_v9, %v120_v36 }
  0x94   :  { %v304_v37 = vpop.eup %303  ;;  %v185_v2 = vadd.f32 %v171_v40, %v121_v39  ;;  %315 = vpow2.f32 %v55_v7 }
  0x95   :  { %v306_v41 = vpop.eup %305  ;;  %v192_v55 = vmul.f32 %v296_v20, %v184_v49 }
  0x96   :  { %v308_v42 = vpop.eup %307  ;;  %v117_v43 = vadd.f32 %v306_v41, %v304_v37  ;;  %v193_v56 = vmul.f32 %v298_v23, %v185_v2 }
  0x97   :  { %v310_v45 = vpop.eup %309  ;;  %v194_v1 = vmul.f32 %v308_v42, %v186_v8 }
  0x98   :  { %v312_v46 = vpop.eup %311  ;;  %118 = vadd.xlane.f32.xlu1 %v117_v43  ;;  %v111_v47 = vadd.f32 %v310_v45, %v308_v42  ;;  %v195_v48 = vmul.f32 %v310_v45, %v187_v38  ;;  %v200_v60 = vadd.f32 %v193_v56, %v192_v55 }
  0x99   :  { %v314_v50 = vpop.eup %313  ;;  %v181_v57 = vmul.f32 0.6931472, %v312_v46 }
  0x9a   :  { %112 = vadd.xlane.f32.xlu2 %v111_v47  ;;  %v203_v51 = vadd.f32 %v195_v48, %v194_v1  ;;  %v183_v58 = vmul.f32 0.6931472, %v314_v50  ;;  %v316_v13 = vpop.eup %315 }
  0x9b   :  { %v190_v61 = vadd.f32 %v181_v57, %v126_v53  ;;  %v57_v14 = vadd.f32 1.0, %v316_v13 }
  0x9c   :  { %204 = vadd.xlane.f32.xlu0 %v203_v51  ;;  %v191_v62 = vadd.f32 %v183_v58, %v127_v54 }
  0x9d   :  { %v198_v63 = vmul.f32 %v304_v37, %v190_v61  ;;  %317 = vlog2.f32 %v57_v14 }
  0x9e   :  { %v199_v3 = vmul.f32 %v306_v41, %v191_v62 }
  0xa0   :  { %207 = vadd.xlane.f32.xlu1 %v206_v59  ;;  %v209_v5 = vadd.f32 %v199_v3, %v198_v63 }
  0xa2   :  { %201 = vadd.xlane.f32.xlu2 %v200_v60 }
  0xa3   :  { %v318_v15 = vpop.eup %317 }
  0xa4   :  { %v59_v17 = vmul.f32 0.6931472, %v318_v15 }
  0xa6   :  { %v60_v18 = vadd.f32 %v59_v17, %v52_v16 }
  0xa8   :  { %v62_v19 = vsel %vm61_vm0, %v60_v18, 0.0 }
  0xa9   :  { %63 = vadd.xlane.f32.xlu0 %v62_v19 }
  0xaa   :  { %210 = vadd.xlane.f32.xlu2 %v209_v5 }
 0x103   :  { %v116_v21 = vpop.xlane.xlu0 %115 }
 0x105   :  { %v110_v20 = vpop.xlane.xlu2 %109 }
 0x10b   :  { %v119_v22 = vpop.xlane.xlu1 %118 }
 0x10d   :  { %v113_v23 = vpop.xlane.xlu2 %112 }
 0x10e   :  { %319 = vrcp.f32 %v113_v23 }
 0x10f   :  { %321 = vrcp.f32 %v110_v20  ;;  %v205_v25 = vpop.xlane.xlu0 %204 }
 0x110   :  { %323 = vrcp.f32 %v116_v21 }
 0x111   :  { %325 = vrcp.f32 %v119_v22 }
 0x113   :  { %v208_v30 = vpop.xlane.xlu1 %207 }
 0x114   :  { %v320_v24 = vpop.eup %319 }
 0x115   :  { %v322_v26 = vpop.eup %321  ;;  %v217_v27 = vmul.f32 %v320_v24, %v205_v25  ;;  %v202_v28 = vpop.xlane.xlu2 %201 }
 0x116   :  { %v216_v29 = vmul.f32 %v322_v26, %v202_v28  ;;  %v324_v33 = vpop.eup %323 }
 0x117   :  { %v222_v31 = vsel %vm220_vm1, %v217_v27, 0.0  ;;  %v218_v34 = vmul.f32 %v324_v33, %v208_v30  ;;  %v326_v8 = vpop.eup %325 }
 0x118   :  { %v221_v32 = vsel %vm220_vm1, %v216_v29, 0.0 }
 0x119   :  { %v223_v35 = vadd.f32 %v222_v31, %v221_v32  ;;  %v224_v37 = vsel %vm220_vm1, %v218_v34, 0.0 }
 0x11b   :  { %v225_v39 = vadd.f32 %v224_v37, %v223_v35 }
 0x11c   :  { %v64_v41 = vpop.xlane.xlu0 %63 }
 0x11d   :  { %v211_v36 = vpop.xlane.xlu2 %210  ;;  %v65_v42 = vrot.slane %v64_v41, 4 }
 0x11e   :  { %v219_v38 = vmul.f32 %v326_v8, %v211_v36 }
 0x11f   :  { %v66_v43 = vadd.f32 %v65_v42, %v64_v41 }
 0x120   :  { %v226_v9 = vsel %vm220_vm1, %v219_v38, 0.0 }
 0x121   :  { %v227_v40 = vadd.f32 %v226_v9, %v225_v39  ;;  %v67_v0 = vrot.slane %v66_v43, 2 }
 0x123   :  { %228 = vadd.xlane.f32.xlu1 %v227_v40  ;;  %v68_v44 = vadd.f32 %v67_v0, %v66_v43 }
 0x125   :  { %v69_v45 = vrot.slane %v68_v44, 1 }
 0x127   :  { %v70_v1 = vadd.f32 %v69_v45, %v68_v44 }
 0x129   :  { %258 = vpush %v70_v1 }
 0x15a   :  { %s259_s21 = spop %258 }
 0x196   :  { %v229_v46 = vpop.xlane.xlu1 %228 }
 0x197   :  { %v230_v47 = vrot.slane %v229_v46, 4 }
 0x199   :  { %v231_v48 = vadd.f32 %v230_v47, %v229_v46 }
 0x19b   :  { %v232_v49 = vrot.slane %v231_v48, 2 }
 0x19d   :  { %v233_v2 = vadd.f32 %v232_v49, %v231_v48 }
 0x19f   :  { %v234_v50 = vrot.slane %v233_v2, 1 }
 0x1a1   :  { %v235_v51 = vadd.f32 %v234_v50, %v233_v2 }
 0x1a3   :  { %260 = vpush %v235_v51 }
 0x1d4   :  { %s261_s25 = spop %260 }
 0x1d5   :  { %s237_s26 = sadd.f32 %s261_s25, %s259_s21 }
 0x1d7   :  { %v238_v52 = vstv %s237_s26 }
 0x1d8   :  { %239 = vst [vmem:[#allocation7] sm:$0x1] %v238_v52 }
 0x1d9   :  { %250 = dma.vmem_to_hbm [thread:$0]  %s246_s1, 16, %s248_s24, [#allocation4]  }
 0x1da   :  { %403 = dma.done.wait [#allocation4], 16  }
 0x1db   :  { %404 = vsyncadd [#allocation4], 4294967280 }
 0x1dc   :  { %255 = vsyncpa [#allocation3], 1 }
 0x1dd   :  { %256 = vsyncpa [#allocation6], 1 }
 0x1de   :  { %257 = vsyncpa [#allocation4], 1 }

</bundles_post_ra>
